<compile_context>
chip_gen: v7x
topology: tpu7x:2x2x1
jax: 0.10.0
libtpu: 0.0.40
codegen_flags: <defaults>
</compile_context>

<pallas_src>
import functools

import jax
import jax.numpy as jnp
from jax.experimental import pallas as pl
from jax.experimental.pallas import tpu as pltpu


LOG_STD_MIN = -20.0
LOG_STD_MAX = 2.0
LANE = 128  # padded feature width used for the lane-dense matmuls


def _round_up(x, m):
    return (x + m - 1) // m * m


def cql_actor_kernel(x_ref, p_ref, out_ref, *, state_pad, action_size):
    P = LANE
    x = x_ref[...]                                    # [TB, state_pad] (native width)

    # Static views into the single resident packed parameter buffer
    # (all row offsets are multiples of 8 -> zero-cost aligned slices).
    w1 = p_ref[0:state_pad, :]                        # [state_pad, P] fc1 (valid rows only)
    w2 = p_ref[1 * P:2 * P, :]                        # [P, P] fc2
    wh = p_ref[2 * P:3 * P, :]                        # [P, P] fused mu|log_std head
    bias = p_ref[3 * P:3 * P + 8, :]                  # one aligned (8,128) load
    b1 = bias[0:1, :]
    b2 = bias[1:2, :]
    bh = bias[2:3, :]
    ls_mask = bias[3:4, :]                            # 1.0 on log_std columns [A, 2A)

    h1 = jnp.maximum(jnp.dot(x, w1, preferred_element_type=jnp.float32) + b1, 0.0)
    h2 = jnp.maximum(jnp.dot(h1, w2, preferred_element_type=jnp.float32) + b2, 0.0)
    head = jnp.dot(h2, wh, preferred_element_type=jnp.float32) + bh   # [TB, P]

    # Clamp only the log_std columns; mu columns pass through untouched.
    head = jnp.where(ls_mask > 0.0,
                     jnp.clip(head, LOG_STD_MIN, LOG_STD_MAX),
                     head)

    # Narrow store: only the 2A real columns go back to HBM.
    out_ref[...] = head[:, :2 * action_size].astype(out_ref.dtype)


def pack_params(params, state_size, hidden_size, action_size):
    """Pack all weights/biases (zero-padded to 128 lanes) into one buffer.

    Layout (rows):
      [0, 128)        : W1  (rows 0:S, cols 0:H valid)
      [128, 256)      : W2  (rows 0:H, cols 0:H valid)
      [256, 384)      : W_head = [W_mu | W_log_std]  (rows 0:H, cols 0:2A valid)
      [384, 392)      : row 0 = b1, row 1 = b2, row 2 = [b_mu | b_log_std],
                        row 3 = log_std column mask (1.0 on columns [A, 2A))
    """
    P = LANE
    assert state_size <= P and hidden_size <= P and 2 * action_size <= P

    w1 = jnp.zeros((P, P), jnp.float32).at[:state_size, :hidden_size].set(params["w1"])
    w2 = jnp.zeros((P, P), jnp.float32).at[:hidden_size, :hidden_size].set(params["w2"])
    wh = jnp.zeros((P, P), jnp.float32)
    wh = wh.at[:hidden_size, :action_size].set(params["wmu"])
    wh = wh.at[:hidden_size, action_size:2 * action_size].set(params["wls"])

    bias = jnp.zeros((8, P), jnp.float32)
    bias = bias.at[0, :hidden_size].set(params["b1"][0])
    bias = bias.at[1, :hidden_size].set(params["b2"][0])
    bias = bias.at[2, :action_size].set(params["bmu"][0])
    bias = bias.at[2, action_size:2 * action_size].set(params["bls"][0])
    bias = bias.at[3, action_size:2 * action_size].set(1.0)   # log_std column mask

    return jnp.concatenate([w1, w2, wh, bias], axis=0)   # [3*P + 8, P]


@functools.partial(jax.jit, static_argnames=("action_size", "batch_tile"))
def cql_actor_forward(state, packed_params, *, action_size, batch_tile=4096):
    """state: [B, state_size] float32; packed_params from pack_params().

    Returns (mu, log_std), each [B, action_size] float32.
    """
    B, S = state.shape

    # Pad the state feature dim only up to the next multiple of 8 (usually a
    # no-op) so the in-kernel W1 slice stays sublane-aligned.  Padded columns
    # hit zero weight rows, so the result is exact.
    S_in = _round_up(S, 8)
    if S_in != S:
        state = jnp.pad(state, ((0, 0), (0, S_in - S)))

    # Batch tiling:
    #  * TB=4096 default keeps each grid step moving enough bytes to be near
    #    the HBM roofline while staying well under v5e's 16 MiB scoped-VMEM
    #    default (~7 MiB live at TB=4096).
    #  * for B <= batch_tile, cap TB at round_up(cdiv(B,2),8) so the grid has
    #    >= 2 steps whenever possible and v7x's 2 TensorCores both get work.
    if B <= batch_tile:
        TB = max(8, _round_up(pl.cdiv(B, 2), 8))
    else:
        TB = batch_tile
    grid = (pl.cdiv(B, TB),)   # ragged last tile is masked by Pallas

    kernel = functools.partial(cql_actor_kernel,
                               state_pad=S_in, action_size=action_size)

    out = pl.pallas_call(
        kernel,
        out_shape=jax.ShapeDtypeStruct((B, 2 * action_size), jnp.float32),
        grid=grid,
        in_specs=[
            # state at native width: last dim equals the full array dim.
            pl.BlockSpec((TB, S_in), lambda i: (i, 0)),
            # packed params: whole array resident in VMEM, single buffer.
            pl.BlockSpec(memory_space=pltpu.MemorySpace.VMEM),
        ],
        out_specs=pl.BlockSpec((TB, 2 * action_size), lambda i: (i, 0)),
        compiler_params=pltpu.CompilerParams(
            dimension_semantics=("parallel",)),   # v7x: shard batch over 2 TCs
    )(state, packed_params)

    mu = out[:, :action_size]
    log_std = out[:, action_size:]
    return mu, log_std


def init_params(key, state_size, action_size, hidden_size=32, init_w=0.003):
    """Deterministic synthetic init (shapes match nn.Linear layers, [in, out])."""
    ks = jax.random.split(key, 8)

    def lin(kw, kb, fan_in, fan_out, scale=None):
        bound = scale if scale is not None else 1.0 / jnp.sqrt(fan_in)
        w = jax.random.uniform(kw, (fan_in, fan_out), jnp.float32, -bound, bound)
        b = jax.random.uniform(kb, (1, fan_out), jnp.float32, -bound, bound)
        return w, b

    w1, b1 = lin(ks[0], ks[1], state_size, hidden_size)
    w2, b2 = lin(ks[2], ks[3], hidden_size, hidden_size)
    wmu, bmu = lin(ks[4], ks[5], hidden_size, action_size, scale=init_w)
    wls, bls = lin(ks[6], ks[7], hidden_size, action_size, scale=init_w)
    return dict(w1=w1, b1=b1, w2=w2, b2=b2,
                wmu=wmu, bmu=bmu, wls=wls, bls=bls)


def reference_forward(state, p):
    x = jnp.maximum(state @ p["w1"] + p["b1"], 0.0)
    x = jnp.maximum(x @ p["w2"] + p["b2"], 0.0)
    mu = x @ p["wmu"] + p["bmu"]
    ls = jnp.clip(x @ p["wls"] + p["bls"], LOG_STD_MIN, LOG_STD_MAX)
    return mu, ls


# TODO(synk): evaluate()/get_action() (Normal.rsample + tanh squash + log_prob)
# are host-side sampling utilities and are intentionally not part of the kernel.

if __name__ == "__main__":
    key = jax.random.PRNGKey(0)
    k_state, k_params = jax.random.split(key)

    batch = 8
    state_size = 16
    hidden_size = 32
    action_size = 4

    state = jax.random.normal(k_state, (batch, state_size), jnp.float32)
    params = init_params(k_params, state_size, action_size, hidden_size)
    packed = pack_params(params, state_size, hidden_size, action_size)

    mu, log_std = cql_actor_forward(state, packed, action_size=action_size)
    jax.block_until_ready((mu, log_std))

    mu_ref, ls_ref = reference_forward(state, params)
    assert mu.shape == (batch, action_size)
    assert log_std.shape == (batch, action_size)
    assert jnp.allclose(mu, mu_ref, atol=1e-4), float(jnp.max(jnp.abs(mu - mu_ref)))
    assert jnp.allclose(log_std, ls_ref, atol=1e-4), float(jnp.max(jnp.abs(log_std - ls_ref)))

    print("KERNEL_OK")
</pallas_src>

<mosaic_0001>
module attributes {stable_mosaic.version = 11 : i64} {
  func.func @cql_actor_kernel(%arg0: i32, %arg1: memref<8x16xf32, #tpu.memory_space<vmem>>, %arg2: memref<392x128xf32, #tpu.memory_space<vmem>>, %arg3: memref<8x8xf32, #tpu.memory_space<vmem>>) attributes {dimension_semantics = [#tpu.dimension_semantics<parallel>], iteration_bounds = array<i64: 1>, scalar_prefetch = 0 : i64, scratch_operands = 0 : i64, tpu.core_type = #tpu.core_type<tc>, window_params = [{transform_indices = @transform_0, window_bounds = array<i64: 8, 16>}, {pipeline_mode = #tpu.pipeline_mode<synchronous>, transform_indices = @transform_1, window_bounds = array<i64: 392, 128>}, {transform_indices = @transform_2, window_bounds = array<i64: 8, 8>}]} {
    %c0 = arith.constant 0 : index
    %c0_0 = arith.constant 0 : index
    %0 = vector.load %arg1[%c0, %c0_0] : memref<8x16xf32, #tpu.memory_space<vmem>>, vector<8x16xf32>
    %c0_1 = arith.constant 0 : index
    %c0_2 = arith.constant 0 : index
    %1 = vector.load %arg2[%c0_1, %c0_2] : memref<392x128xf32, #tpu.memory_space<vmem>>, vector<16x128xf32>
    %c128 = arith.constant 128 : index
    %c0_3 = arith.constant 0 : index
    %2 = vector.load %arg2[%c128, %c0_3] : memref<392x128xf32, #tpu.memory_space<vmem>>, vector<128x128xf32>
    %c256 = arith.constant 256 : index
    %c0_4 = arith.constant 0 : index
    %3 = vector.load %arg2[%c256, %c0_4] : memref<392x128xf32, #tpu.memory_space<vmem>>, vector<128x128xf32>
    %c384 = arith.constant 384 : index
    %c0_5 = arith.constant 0 : index
    %4 = vector.load %arg2[%c384, %c0_5] : memref<392x128xf32, #tpu.memory_space<vmem>>, vector<8x128xf32>
    %5 = vector.extract_strided_slice %4 {offsets = [0, 0], sizes = [1, 128], strides = [1, 1]} : vector<8x128xf32> to vector<1x128xf32>
    %6 = vector.extract_strided_slice %4 {offsets = [1, 0], sizes = [1, 128], strides = [1, 1]} : vector<8x128xf32> to vector<1x128xf32>
    %7 = vector.extract_strided_slice %4 {offsets = [2, 0], sizes = [1, 128], strides = [1, 1]} : vector<8x128xf32> to vector<1x128xf32>
    %8 = vector.extract_strided_slice %4 {offsets = [3, 0], sizes = [1, 128], strides = [1, 1]} : vector<8x128xf32> to vector<1x128xf32>
    %cst = arith.constant dense<0.000000e+00> : vector<8x128xf32>
    %9 = tpu.matmul %0, %1, %cst {dimension_numbers = #tpu.dot_dimension_numbers<[1], [0], [0], [1], [0, 0, 1, 1], [], []>} : vector<8x16xf32>, vector<16x128xf32>, vector<8x128xf32> -> vector<8x128xf32>
    %10 = vector.broadcast %5 : vector<1x128xf32> to vector<8x128xf32>
    %11 = arith.addf %9, %10 : vector<8x128xf32>
    %cst_6 = arith.constant 0.000000e+00 : f32
    %12 = vector.broadcast %cst_6 : f32 to vector<8x128xf32>
    %13 = arith.maximumf %11, %12 : vector<8x128xf32>
    %cst_7 = arith.constant dense<0.000000e+00> : vector<8x128xf32>
    %14 = tpu.matmul %13, %2, %cst_7 {dimension_numbers = #tpu.dot_dimension_numbers<[1], [0], [0], [1], [0, 0, 1, 1], [], []>} : vector<8x128xf32>, vector<128x128xf32>, vector<8x128xf32> -> vector<8x128xf32>
    %15 = vector.broadcast %6 : vector<1x128xf32> to vector<8x128xf32>
    %16 = arith.addf %14, %15 : vector<8x128xf32>
    %cst_8 = arith.constant 0.000000e+00 : f32
    %17 = vector.broadcast %cst_8 : f32 to vector<8x128xf32>
    %18 = arith.maximumf %16, %17 : vector<8x128xf32>
    %cst_9 = arith.constant dense<0.000000e+00> : vector<8x128xf32>
    %19 = tpu.matmul %18, %3, %cst_9 {dimension_numbers = #tpu.dot_dimension_numbers<[1], [0], [0], [1], [0, 0, 1, 1], [], []>} : vector<8x128xf32>, vector<128x128xf32>, vector<8x128xf32> -> vector<8x128xf32>
    %20 = vector.broadcast %7 : vector<1x128xf32> to vector<8x128xf32>
    %21 = arith.addf %19, %20 : vector<8x128xf32>
    %cst_10 = arith.constant 0.000000e+00 : f32
    %22 = vector.broadcast %cst_10 : f32 to vector<1x128xf32>
    %23 = arith.cmpf ogt, %8, %22 : vector<1x128xf32>
    %cst_11 = arith.constant -2.000000e+01 : f32
    %cst_12 = arith.constant 2.000000e+00 : f32
    %24 = vector.broadcast %cst_11 : f32 to vector<8x128xf32>
    %25 = arith.maximumf %24, %21 : vector<8x128xf32>
    %26 = vector.broadcast %cst_12 : f32 to vector<8x128xf32>
    %27 = arith.minimumf %26, %25 : vector<8x128xf32>
    %28 = vector.shape_cast %23 : vector<1x128xi1> to vector<1x128xi1>
    %29 = vector.broadcast %28 : vector<1x128xi1> to vector<8x128xi1>
    %30 = arith.select %29, %27, %21 : vector<8x128xi1>, vector<8x128xf32>
    %31 = vector.extract_strided_slice %30 {offsets = [0, 0], sizes = [8, 8], strides = [1, 1]} : vector<8x128xf32> to vector<8x8xf32>
    %c0_13 = arith.constant 0 : index
    %c0_14 = arith.constant 0 : index
    %32 = vector.load %arg3[%c0_13, %c0_14] : memref<8x8xf32, #tpu.memory_space<vmem>>, vector<8x8xf32>
    tpu.vector_store %arg3[%c0_13, %c0_14], %31 {strides = array<i32>} : memref<8x8xf32, #tpu.memory_space<vmem>>, vector<8x8xf32>,
    return
  }
  func.func @transform_0(%arg0: i32) -> (i32, i32) {
    %c0_i32 = arith.constant 0 : i32
    %c0_i32_0 = arith.constant 0 : i32
    return %arg0, %c0_i32 : i32, i32
  }
  func.func @transform_1(%arg0: i32) -> (i32, i32) {
    %c0_i32 = arith.constant 0 : i32
    %c0_i32_0 = arith.constant 0 : i32
    %c0_i32_1 = arith.constant 0 : i32
    return %c0_i32, %c0_i32_0 : i32, i32
  }
  func.func @transform_2(%arg0: i32) -> (i32, i32) {
    %c0_i32 = arith.constant 0 : i32
    %c0_i32_0 = arith.constant 0 : i32
    return %arg0, %c0_i32 : i32, i32
  }
}

</mosaic_0001>

<bundles_post_ra>
// kernel: cql_actor_forward.1
= control target key start
LH: loop header
LB: loop body
LE: loop exit
PB: predicated region body
PF: predicated region fallthrough
CT: control target
= control target key end

     0   :  { %7 = vsyncpa [#allocation3], 0  ;;  %s618_s0 = inlined_call_operand.hbm [shape: f32[8,16], index: 0, kind: input, shape index: {}]   ;;  %s619_s1 = inlined_call_operand.hbm [shape: f32[392,128], index: 1, kind: input, shape index: {}]   ;;  %s620_s2 = inlined_call_operand.vmem [shape: f32[8,8], index: 2, kind: output, shape index: {}]  }
   0x1   :  { %8 = vsyncpa [#allocation5], 0  ;;  %s541_s9 = smov [#allocation2]   ;;  %s542_s11 = smov [#allocation4]  }
   0x2   :  { %s15_s10 = sshll.u32 %s541_s9, 4  ;;  %s24_s12 = sshll.u32 %s542_s11, 4  ;;  %s16_s10 = int_to_ptr.vmem [resolvable:$true] %s15_s10  ;;  %s564_s12 = int_to_ptr.vmem [resolvable:$true] %s24_s12 }
   0x3   :  { %s493_s15 = scalar_lea.hbm %s618_s0, 128 }
   0x4   :  { %p494_p0 = scmp.ne.s32.totalorder %s618_s0, %s493_s15  ;;  %p497_p1 = scmp.lt.u32.totalorder %s493_s15, %s618_s0 }
   0x6   :  { %p499_p2 = pnand %p497_p1, %p494_p0 }
   0x8   :  { %502 = shalt.err (!%p499_p2)
}
   0x9   :  { %s503_s20 = scalar_lea.vmem %s16_s10, 128  ;;  %p508_p4 = scmp.lt.s32.totalorder %s16_s10, %s16_s10 }
   0xa   :  { %p504_p3 = scmp.ne.s32.totalorder %s16_s10, %s503_s20  ;;  %p509_p5 = scmp.lt.s32.totalorder %s503_s20, %s503_s20 }
   0xc   :  { %p510_p6 = por %p509_p5, %p508_p4 }
   0xe   :  { %p511_p7 = pnand %p510_p6, %p504_p3 }
  0x10   :  { %514 = shalt.err (!%p511_p7)
}
  0x11   :  { %18 = dma.hbm_to_vmem [thread:$0]  %s618_s0, 128, %s16_s10, [#allocation3]  }
  0x12   :  { %s515_s25 = scalar_lea.hbm %s619_s1, 6272 }
  0x13   :  { %p516_p8 = scmp.ne.s32.totalorder %s619_s1, %s515_s25  ;;  %p519_p9 = scmp.lt.u32.totalorder %s515_s25, %s619_s1 }
  0x15   :  { %p521_p10 = pnand %p519_p9, %p516_p8 }
  0x17   :  { %524 = shalt.err (!%p521_p10)
}
  0x18   :  { %s525_s30 = scalar_lea.vmem %s564_s12, 6272  ;;  %p530_p12 = scmp.lt.s32.totalorder %s564_s12, %s564_s12 }
  0x19   :  { %p526_p11 = scmp.ne.s32.totalorder %s564_s12, %s525_s30  ;;  %p531_p13 = scmp.lt.s32.totalorder %s525_s30, %s525_s30 }
  0x1b   :  { %p532_p0 = por %p531_p13, %p530_p12 }
  0x1d   :  { %p533_p1 = pnand %p532_p0, %p526_p11 }
  0x1f   :  { %536 = shalt.err (!%p533_p1)
}
  0x20   :  { %s543_s0 = smov 128   ;;  %s544_s3 = smov 8  }
  0x21   :  { %30 = dma.hbm_to_vmem [thread:$0]  %s619_s1, 6272, %s564_s12, [#allocation5], %s543_s0, %s543_s0, %s544_s3  }
  0x22   :  { %537 = dma.done.wait [#allocation3], 128  }
  0x23   :  { %538 = vsyncadd [#allocation3], 4294967168 }
  0x24   :  { %539 = dma.done.wait [#allocation5], 6272  }
  0x25   :  { %540 = vsyncadd [#allocation5], 4294961024  ;;  %v545_v0 = vmov 0.0|0.0   ;;  %vm546_vm0 = vmmov 0   ;;  %v547_v1 = vmov 0.0   ;;  %v38_v2 = vld [vmem:[#allocation4] sm:$0xff]  ;;  %v73_v51 = vlaneseq }
  0x26   :  { %434 = vmatprep.subr.bf16.mxu0 %v545_v0  ;;  %361 = vmatprep.mubr.msk.f32.mxu0 %vm546_vm0, %v547_v1  ;;  %v39_v3 = vld [vmem:[#allocation4 + $0x8] sm:$0xff]  ;;  %v40_v5 = vld [vmem:[#allocation4 + $0x80] sm:$0xff]  ;;  %v42_v7 = vld [vmem:[#allocation4 + $0x90] sm:$0xff]  ;;  %vm77_vm1 = vcmask 130048   ;;  %vm311_vm4 = vcmask 64512  }
  0x27   :  { %437 = vmatprep.subr.bf16.mxu1 %v545_v0  ;;  %396 = vmatprep.mubr.msk.f32.mxu1 %vm546_vm0, %v547_v1  ;;  %v435_v4 = vpack.c.bf16 %v39_v3, %v38_v2  ;;  %v41_v6 = vld [vmem:[#allocation4 + $0x88] sm:$0xff]  ;;  %v43_v9 = vld [vmem:[#allocation4 + $0x98] sm:$0xff]  ;;  %v44_v12 = vld [vmem:[#allocation4 + $0xa0] sm:$0xff]  ;;  %v74_v52 = vshrl.u32 %v73_v51, 7 }
  0x28   :  { %v438_v8 = vpack.c.bf16 %v41_v6, %v40_v5  ;;  %v37_v10 = vld [vmem:[#allocation2] sm:$0xff]  ;;  %v441_v11 = vpack.c.bf16 %v43_v9, %v42_v7  ;;  %v45_v13 = vld [vmem:[#allocation4 + $0xa8] sm:$0xff]  ;;  %v46_v15 = vld [vmem:[#allocation4 + $0xb0] sm:$0xff] }
  0x29   :  { %436 = vmatpush3.bf16.msra.mxu0 %v435_v4  ;;  %v444_v14 = vpack.c.bf16 %v45_v13, %v44_v12  ;;  %v47_v16 = vld [vmem:[#allocation4 + $0xb8] sm:$0xff]  ;;  %v48_v18 = vld [vmem:[#allocation4 + $0xc0] sm:$0xff]  ;;  %v49_v19 = vld [vmem:[#allocation4 + $0xc8] sm:$0xff]  ;;  %v75_v53 = vsub.s32 0, %v74_v52  ;;  %v154_v63 = vsub.s32 1, %v74_v52  ;;  %v229_v5 = vsub.s32 2, %v74_v52 }
  0x2a   :  { %439 = vmatpush3.bf16.msra.mxu1 %v438_v8  ;;  %461 = vmatprep.subr.bf16.mxu0 %v545_v0  ;;  %v447_v17 = vpack.c.bf16 %v47_v16, %v46_v15  ;;  %v450_v20 = vpack.c.bf16 %v49_v19, %v48_v18  ;;  %v50_v21 = vld [vmem:[#allocation4 + $0xd0] sm:$0xff]  ;;  %v51_v22 = vld [vmem:[#allocation4 + $0xd8] sm:$0xff]  ;;  %v52_v24 = vld [vmem:[#allocation4 + $0xe0] sm:$0xff]  ;;  %v307_v6 = vsub.s32 3, %v74_v52  ;;  %v548_v8 = vmov 0  }
  0x2b   :  { %440 = vmatprep.subr.bf16.mxu1 %v545_v0  ;;  %v453_v23 = vpack.c.bf16 %v51_v22, %v50_v21  ;;  %v53_v25 = vld [vmem:[#allocation4 + $0xe8] sm:$0xff]  ;;  %v54_v27 = vld [vmem:[#allocation4 + $0xf0] sm:$0xff]  ;;  %v55_v28 = vld [vmem:[#allocation4 + $0xf8] sm:$0xff] }
  0x2c   :  { %362 = vmatmul.mubr.msk.f32.vlgmr.msra.gmra.mrb[0].mxu0 %vm77_vm1, %v37_v10  ;;  %v456_v26 = vpack.c.bf16 %v53_v25, %v52_v24  ;;  %v459_v29 = vpack.c.bf16 %v55_v28, %v54_v27  ;;  %v56_v30 = vld [vmem:[#allocation4 + $0x100] sm:$0xff]  ;;  %v57_v31 = vld [vmem:[#allocation4 + $0x108] sm:$0xff]  ;;  %v58_v32 = vld [vmem:[#allocation4 + $0x110] sm:$0xff] }
  0x2d   :  { %431 = vmatprep.mubr.msk.f32.mxu0 %vm546_vm0, %v547_v1  ;;  %v462_v33 = vpack.c.bf16 %v57_v31, %v56_v30  ;;  %v59_v34 = vld [vmem:[#allocation4 + $0x118] sm:$0xff]  ;;  %v60_v36 = vld [vmem:[#allocation4 + $0x120] sm:$0xff]  ;;  %v61_v37 = vld [vmem:[#allocation4 + $0x128] sm:$0xff] }
  0x2e   :  { %442 = vmatpush3.bf16.msra.mxu1 %v441_v11  ;;  %v465_v35 = vpack.c.bf16 %v59_v34, %v58_v32  ;;  %v468_v38 = vpack.c.bf16 %v61_v37, %v60_v36  ;;  %v62_v39 = vld [vmem:[#allocation4 + $0x130] sm:$0xff]  ;;  %v63_v40 = vld [vmem:[#allocation4 + $0x138] sm:$0xff]  ;;  %v64_v42 = vld [vmem:[#allocation4 + $0x140] sm:$0xff] }
  0x2f   :  { %443 = vmatprep.subr.bf16.mxu1 %v545_v0  ;;  %463 = vmatpush3.bf16.msra.mxu0 %v462_v33  ;;  %v471_v41 = vpack.c.bf16 %v63_v40, %v62_v39  ;;  %v65_v43 = vld [vmem:[#allocation4 + $0x148] sm:$0xff]  ;;  %v66_v45 = vld [vmem:[#allocation4 + $0x150] sm:$0xff]  ;;  %v67_v46 = vld [vmem:[#allocation4 + $0x158] sm:$0xff] }
  0x30   :  { %464 = vmatprep.subr.bf16.mxu0 %v545_v0  ;;  %v474_v44 = vpack.c.bf16 %v65_v43, %v64_v42  ;;  %v477_v47 = vpack.c.bf16 %v67_v46, %v66_v45  ;;  %v68_v48 = vld [vmem:[#allocation4 + $0x160] sm:$0xff]  ;;  %v69_v49 = vld [vmem:[#allocation4 + $0x168] sm:$0xff]  ;;  %v70_v60 = vld [vmem:[#allocation4 + $0x170] sm:$0xff] }
  0x31   :  { %v480_v50 = vpack.c.bf16 %v69_v49, %v68_v48  ;;  %v72_v54 = vld [vmem:[#allocation4 + $0x180] sm:$0xff]  ;;  %v71_v61 = vld [vmem:[#allocation4 + $0x178] sm:$0xff] }
  0x32   :  { %445 = vmatpush3.bf16.msra.mxu1 %v444_v14  ;;  %v76_v55 = vrot.slane %v72_v54, %v75_v53  ;;  %v483_v62 = vpack.c.bf16 %v71_v61, %v70_v60  ;;  %v155_v1 = vrot.slane %v72_v54, %v154_v63  ;;  %vm301_vm2 = vcmp.gt.f32.partialorder %v72_v54, 0.0 }
  0x33   :  { %446 = vmatprep.subr.bf16.mxu1 %v545_v0  ;;  %466 = vmatpush3.bf16.msra.mxu0 %v465_v35  ;;  %v230_v7 = vrot.slane %v72_v54, %v229_v5  ;;  %v304_v9 = vsel %vm301_vm2, 1, %v548_v8 }
  0x34   :  { %467 = vmatprep.subr.bf16.mxu0 %v545_v0  ;;  %v308_v11 = vrot.slane %v304_v9, %v307_v6 }
  0x36   :  { %448 = vmatpush3.bf16.msra.mxu1 %v447_v17  ;;  %vm309_vm3 = vcmp.eq.s32.totalorder %v308_v11, 1 }
  0x37   :  { %449 = vmatprep.subr.bf16.mxu1 %v545_v0  ;;  %469 = vmatpush3.bf16.msra.mxu0 %v468_v38 }
  0x38   :  { %470 = vmatprep.subr.bf16.mxu0 %v545_v0 }
  0x3a   :  { %451 = vmatpush3.bf16.msra.mxu1 %v450_v20 }
  0x3b   :  { %452 = vmatprep.subr.bf16.mxu1 %v545_v0  ;;  %472 = vmatpush3.bf16.msra.mxu0 %v471_v41 }
  0x3c   :  { %473 = vmatprep.subr.bf16.mxu0 %v545_v0 }
  0x3e   :  { %454 = vmatpush3.bf16.msra.mxu1 %v453_v23 }
  0x3f   :  { %455 = vmatprep.subr.bf16.mxu1 %v545_v0  ;;  %475 = vmatpush3.bf16.msra.mxu0 %v474_v44 }
  0x40   :  { %476 = vmatprep.subr.bf16.mxu0 %v545_v0 }
  0x42   :  { %457 = vmatpush3.bf16.msra.mxu1 %v456_v26 }
  0x43   :  { %458 = vmatprep.subr.bf16.mxu1 %v545_v0  ;;  %478 = vmatpush3.bf16.msra.mxu0 %v477_v47 }
  0x44   :  { %479 = vmatprep.subr.bf16.mxu0 %v545_v0 }
  0x46   :  { %460 = vmatpush3.bf16.msra.mxu1 %v459_v29 }
  0x47   :  { %481 = vmatpush3.bf16.msra.mxu0 %v480_v50 }
  0x48   :  { %482 = vmatprep.subr.bf16.mxu0 %v545_v0 }
  0x4b   :  { %484 = vmatpush3.bf16.msra.mxu0 %v483_v62 }
  0xff   :  { %v147_v56 = vpop.f32.mrb[0].mxu0 }
 0x100   :  { %v148_v57 = vadd.f32 %v147_v56, %v76_v55  ;;  %v363_v58 = vpop.f32.mrb[1].mxu0 }
 0x102   :  { %v151_v59 = vmax.f32 %v148_v57, 0.0 }
 0x104   :  { %397 = vmatmul.mubr.f32.vlgmr.msra.gmra.mrb[0].mxu1 %v151_v59 }
 0x1d7   :  { %v222_v2 = vpop.f32.mrb[0].mxu1 }
 0x1d8   :  { %v223_v3 = vadd.f32 %v222_v2, %v155_v1  ;;  %v398_v4 = vpop.f32.mrb[1].mxu1 }
 0x1da   :  { %v226_v0 = vmax.f32 %v223_v3, 0.0 }
 0x1dc   :  { %432 = vmatmul.mubr.f32.vlgmr.msra.gmra.mrb[2].mxu0 %v226_v0 }
 0x2af   :  { %v297_v10 = vpop.f32.mrb[2].mxu0 }
 0x2b0   :  { %v298_v12 = vadd.f32 %v297_v10, %v230_v7  ;;  %v433_v13 = vpop.f32.mrb[3].mxu0 }
 0x2b2   :  { %v302_v14 = vmax.f32 %v298_v12, -20.0 }
 0x2b4   :  { %v303_v15 = vmin.f32 %v302_v14, 2.0 }
 0x2b6   :  { %v310_v16 = vsel %vm309_vm3, %v303_v15, %v298_v12 }
 0x2b7   :  { %312 = vst.msk [vmem:[%s620_s2] sm:$0xff] %vm311_vm4, %v310_v16 }
 0x2b8   :  { %317 = vsyncpa [#allocation3], 1 }
 0x2b9   :  { %318 = vsyncpa [#allocation5], 1 }

</bundles_post_ra>
